<compile_context>
chip_gen: v7x
topology: tpu7x:2x2x1
jax: 0.10.0
libtpu: 0.0.40
codegen_flags: <defaults>
</compile_context>

<pallas_src>
import functools

import jax
import jax.numpy as jnp
from jax.experimental import pallas as pl
from jax.experimental.pallas import tpu as pltpu


# Safe on every generation: above the 16 MiB (v5e) / 32 MiB (v6e, v7x) scoped
# defaults, below v7x's 64 MiB physical VMEM per TensorCore.
_VMEM_LIMIT_BYTES = 48 * 1024 * 1024


def _round_up(x, m):
    return ((x + m - 1) // m) * m


def _pick_block_rows(rows, lane_width, itemsize, target_bytes=4 << 20, max_rows=1024):
    """Row-tile size: a few MiB per buffer (mem-bound roofline), multiple of 8,
    and leaving >= ~8 grid steps for megacore sharding when rows are large."""
    lane_pad = _round_up(max(lane_width, 128), 128)   # VMEM pads lanes to 128
    br = (target_bytes // (lane_pad * itemsize)) // 8 * 8
    br = max(8, min(max_rows, br))
    if br >= rows:
        return rows                       # block dim == array dim is always legal
    while br >= 512 and pl.cdiv(rows, br) < 8:
        br //= 2                          # keep both v7x TensorCores streaming
    return br


# ----------------------------------------------------------------------------
# LayerNorm
# ----------------------------------------------------------------------------
def _ln_rowwise_kernel(x_ref, w_ref, b_ref, o_ref, *, eps, inv_c):
    # x_ref: (br, C);  w_ref/b_ref: (1, C) f32
    x = x_ref[...].astype(jnp.float32)
    sx = jnp.sum(x, axis=-1, keepdims=True)
    sxx = jnp.sum(x * x, axis=-1, keepdims=True)
    mean = sx * inv_c
    var = jnp.maximum(sxx * inv_c - mean * mean, 0.0)   # biased variance
    inv = jax.lax.rsqrt(var + eps)
    scale = inv * w_ref[...]
    o_ref[...] = ((x - mean) * scale + b_ref[...]).astype(o_ref.dtype)


def _ln_packed_kernel(x_ref, w_ref, b_ref, seg_ref, o_ref, *, eps, inv_c):
    # x_ref: (br, L) with L = g*C; each physical row packs g logical rows.
    # seg_ref: (L, L) block-diagonal 0/1 matrix -> per-segment sums via MXU.
    x = x_ref[...].astype(jnp.float32)
    seg = seg_ref[...]
    sx = jnp.dot(x, seg, preferred_element_type=jnp.float32)
    sxx = jnp.dot(x * x, seg, preferred_element_type=jnp.float32)
    mean = sx * inv_c
    var = jnp.maximum(sxx * inv_c - mean * mean, 0.0)
    inv = jax.lax.rsqrt(var + eps)
    scale = inv * w_ref[...]
    o_ref[...] = ((x - mean) * scale + b_ref[...]).astype(o_ref.dtype)


def layernorm(x2d, weight, bias, eps=1e-5):
    rows, c = x2d.shape
    dtype = x2d.dtype
    itemsize = jnp.dtype(dtype).itemsize
    g = 128 // c if (c < 128 and 128 % c == 0) else 1

    if g > 1 and rows % g == 0:
        # Lane-dense path: (rows, C) -> (rows/g, g*C) so the output last dim
        # is a multiple of 128 (unmasked stores).
        L = g * c
        rows2 = rows // g
        xp = x2d.reshape(rows2, L)
        wp = jnp.tile(weight.reshape(1, c).astype(jnp.float32), (1, g))
        bp = jnp.tile(bias.reshape(1, c).astype(jnp.float32), (1, g))
        lane = jnp.arange(L) // c
        seg = (lane[:, None] == lane[None, :]).astype(jnp.float32)

        br = _pick_block_rows(rows2, L, itemsize)
        out = pl.pallas_call(
            functools.partial(_ln_packed_kernel, eps=eps, inv_c=1.0 / c),
            out_shape=jax.ShapeDtypeStruct((rows2, L), dtype),
            grid_spec=pltpu.PrefetchScalarGridSpec(
                num_scalar_prefetch=0,
                grid=(pl.cdiv(rows2, br),),
                in_specs=[
                    pl.BlockSpec((br, L), lambda i: (i, 0)),
                    pl.BlockSpec((1, L), lambda i: (0, 0)),
                    pl.BlockSpec((1, L), lambda i: (0, 0)),
                    pl.BlockSpec((L, L), lambda i: (0, 0)),
                ],
                out_specs=pl.BlockSpec((br, L), lambda i: (i, 0)),
            ),
            compiler_params=pltpu.CompilerParams(
                dimension_semantics=("parallel",),
                vmem_limit_bytes=_VMEM_LIMIT_BYTES),
        )(xp, wp, bp, seg)
        return out.reshape(rows, c)

    # General path (C >= 128, or no clean packing).
    w2 = weight.reshape(1, c).astype(jnp.float32)
    b2 = bias.reshape(1, c).astype(jnp.float32)
    br = _pick_block_rows(rows, c, itemsize)
    return pl.pallas_call(
        functools.partial(_ln_rowwise_kernel, eps=eps, inv_c=1.0 / c),
        out_shape=jax.ShapeDtypeStruct((rows, c), dtype),
        grid_spec=pltpu.PrefetchScalarGridSpec(
            num_scalar_prefetch=0,
            grid=(pl.cdiv(rows, br),),
            in_specs=[
                pl.BlockSpec((br, c), lambda i: (i, 0)),
                pl.BlockSpec((1, c), lambda i: (0, 0)),
                pl.BlockSpec((1, c), lambda i: (0, 0)),
            ],
            out_specs=pl.BlockSpec((br, c), lambda i: (i, 0)),
        ),
        compiler_params=pltpu.CompilerParams(
            dimension_semantics=("parallel",),
            vmem_limit_bytes=_VMEM_LIMIT_BYTES),
    )(x2d, w2, b2)


# ----------------------------------------------------------------------------
# Linear (+ optional fused SiLU)
# ----------------------------------------------------------------------------
def _linear_kernel(x_ref, w_ref, b_ref, o_ref, *, act):
    x = x_ref[...].astype(jnp.float32)
    w = w_ref[...].astype(jnp.float32)
    y = jnp.dot(x, w, preferred_element_type=jnp.float32)
    y = y + b_ref[...]
    if act == "silu":
        y = y * (1.0 / (1.0 + jnp.exp(-y)))
    o_ref[...] = y.astype(o_ref.dtype)


def linear(x2d, w, b, act=None):
    m, k = x2d.shape
    k2, n = w.shape
    assert k == k2
    dtype = x2d.dtype
    itemsize = jnp.dtype(dtype).itemsize
    bn = n if (n % 128 != 0) else min(n, 512)
    bm = _pick_block_rows(m, max(k, bn), itemsize)
    b2 = b.reshape(1, n).astype(jnp.float32)
    # TODO(synk): for very large K the weight tile (K, bn) should also be
    # K-tiled with an accumulator grid axis; unnecessary at these model sizes.
    return pl.pallas_call(
        functools.partial(_linear_kernel, act=act),
        out_shape=jax.ShapeDtypeStruct((m, n), dtype),
        grid_spec=pltpu.PrefetchScalarGridSpec(
            num_scalar_prefetch=0,
            grid=(pl.cdiv(m, bm), pl.cdiv(n, bn)),
            in_specs=[
                pl.BlockSpec((bm, k), lambda i, j: (i, 0)),
                pl.BlockSpec((k, bn), lambda i, j: (0, j)),
                pl.BlockSpec((1, bn), lambda i, j: (0, j)),
            ],
            out_specs=pl.BlockSpec((bm, bn), lambda i, j: (i, j)),
        ),
        compiler_params=pltpu.CompilerParams(
            dimension_semantics=("parallel", "parallel"),
            vmem_limit_bytes=_VMEM_LIMIT_BYTES),
    )(x2d, w, b2)


# ----------------------------------------------------------------------------
# Attention core: softmax(q k^T * scale) v, per (batch * patch * head)
# ----------------------------------------------------------------------------
def _attn_kernel(q_ref, k_ref, v_ref, o_ref, *, scale):
    q = q_ref[...].astype(jnp.float32) * scale     # (bh, n, d)
    k = k_ref[...].astype(jnp.float32)
    v = v_ref[...].astype(jnp.float32)
    s = jnp.einsum('bnd,bmd->bnm', q, k, preferred_element_type=jnp.float32)
    m = jnp.max(s, axis=-1, keepdims=True)
    p = jnp.exp(s - m)
    p = p / jnp.sum(p, axis=-1, keepdims=True)
    o = jnp.einsum('bnm,bmd->bnd', p, v, preferred_element_type=jnp.float32)
    o_ref[...] = o.astype(o_ref.dtype)


def attention_core(q, k, v, scale):
    # q, k, v: (BH, n, d).  Whole (n, n) score tile fits VMEM for these seq
    # lengths. TODO(synk): switch to a flash-style online-softmax kernel for
    # long sequences.
    bh, n, d = q.shape
    itemsize = jnp.dtype(q.dtype).itemsize
    per = max(n * d, n * n) * 4 * itemsize
    bh_tile = max(1, min(bh, (8 << 20) // per))
    spec = pl.BlockSpec((bh_tile, n, d), lambda i: (i, 0, 0))
    return pl.pallas_call(
        functools.partial(_attn_kernel, scale=scale),
        out_shape=jax.ShapeDtypeStruct((bh, n, d), q.dtype),
        grid_spec=pltpu.PrefetchScalarGridSpec(
            num_scalar_prefetch=0,
            grid=(pl.cdiv(bh, bh_tile),),
            in_specs=[spec, spec, spec],
            out_specs=spec,
        ),
        compiler_params=pltpu.CompilerParams(
            dimension_semantics=("parallel",),
            vmem_limit_bytes=_VMEM_LIMIT_BYTES),
    )(q, k, v)


# ----------------------------------------------------------------------------
# Transformer module (JAX/Pallas port of the PyTorch module)
# ----------------------------------------------------------------------------
class Transformer:
    def __init__(self, dim, depth, heads, dim_head, mlp_dim, dropout=0.0, *, key):
        # TODO(synk): dropout not implemented (module default dropout=0.0 / eval mode).
        del mlp_dim  # the reference FeedForward uses dim*2, not mlp_dim
        self.dim = dim
        self.depth = depth
        self.heads = heads
        self.dim_head = dim_head
        self.inner = heads * dim_head
        self.project_out = not (heads == 1 and dim_head == dim)
        self.scale = dim_head ** -0.5
        self.eps = 1e-5

        def lin_init(k, fan_in, fan_out):
            return jax.random.normal(k, (fan_in, fan_out), jnp.float32) * (fan_in ** -0.5)

        self.layers = []
        for _ in range(depth):
            key, k0, k1, k2, k3, k4, k5, k6, k7 = jax.random.split(key, 9)
            p = {
                "ln1_g": 1.0 + 0.1 * jax.random.normal(k4, (dim,), jnp.float32),
                "ln1_b": 0.1 * jax.random.normal(k5, (dim,), jnp.float32),
                "w_qkv": lin_init(k0, dim, 3 * self.inner),
                "b_qkv": jnp.zeros((3 * self.inner,), jnp.float32),   # bias=False
                "w_out": lin_init(k1, self.inner, dim),
                "b_out": 0.02 * jax.random.normal(k6, (dim,), jnp.float32),
                "ln2_g": 1.0 + 0.1 * jax.random.normal(k7, (dim,), jnp.float32),
                "ln2_b": jnp.zeros((dim,), jnp.float32),
                "w1": lin_init(k2, dim, 2 * dim),
                "b1": jnp.zeros((2 * dim,), jnp.float32),
                "w2": lin_init(k3, 2 * dim, dim),
                "b2": jnp.zeros((dim,), jnp.float32),
            }
            self.layers.append(p)

    def __call__(self, x):
        b, pch, n, dim = x.shape
        assert dim == self.dim
        rows = b * pch * n
        h_, d_ = self.heads, self.dim_head

        for p in self.layers:
            # ---- PreNorm + Attention ----
            hnorm = layernorm(x.reshape(rows, dim), p["ln1_g"], p["ln1_b"], self.eps)
            qkv = linear(hnorm, p["w_qkv"], p["b_qkv"])               # (rows, 3*inner)
            qkv = qkv.reshape(b, pch, n, 3, h_, d_)
            qkv = jnp.transpose(qkv, (3, 0, 1, 4, 2, 5))              # (3, b, p, h, n, d)
            q = qkv[0].reshape(b * pch * h_, n, d_)
            k = qkv[1].reshape(b * pch * h_, n, d_)
            v = qkv[2].reshape(b * pch * h_, n, d_)
            o = attention_core(q, k, v, self.scale)                   # (BH, n, d)
            o = o.reshape(b, pch, h_, n, d_)
            o = jnp.transpose(o, (0, 1, 3, 2, 4)).reshape(rows, self.inner)
            if self.project_out:
                o = linear(o, p["w_out"], p["b_out"])
            x = x + o.reshape(b, pch, n, dim)

            # ---- PreNorm + FeedForward ----
            hnorm = layernorm(x.reshape(rows, dim), p["ln2_g"], p["ln2_b"], self.eps)
            hmid = linear(hnorm, p["w1"], p["b1"], act="silu")
            hout = linear(hmid, p["w2"], p["b2"])
            x = x + hout.reshape(b, pch, n, dim)
        return x


# ----------------------------------------------------------------------------
# Pure-JAX reference for correctness checking
# ----------------------------------------------------------------------------
def _reference_transformer(x, model):
    hp = jax.lax.Precision.HIGHEST

    def ln(t, g, b2):
        m = jnp.mean(t, -1, keepdims=True)
        v = jnp.mean((t - m) ** 2, -1, keepdims=True)
        return (t - m) / jnp.sqrt(v + model.eps) * g + b2

    for p in model.layers:
        h = ln(x, p["ln1_g"], p["ln1_b"])
        qkv = jnp.einsum("bpnc,cd->bpnd", h, p["w_qkv"], precision=hp)
        q, k, v = jnp.split(qkv, 3, axis=-1)

        def split_heads(t):
            bb, pp, nn, _ = t.shape
            return t.reshape(bb, pp, nn, model.heads, model.dim_head).transpose(0, 1, 3, 2, 4)

        q, k, v = map(split_heads, (q, k, v))
        dots = jnp.einsum("bphnd,bphmd->bphnm", q, k, precision=hp) * model.scale
        attn = jax.nn.softmax(dots, axis=-1)
        o = jnp.einsum("bphnm,bphmd->bphnd", attn, v, precision=hp)
        o = o.transpose(0, 1, 3, 2, 4).reshape(x.shape[:-1] + (model.inner,))
        if model.project_out:
            o = jnp.einsum("bpnc,cd->bpnd", o, p["w_out"], precision=hp) + p["b_out"]
        x = x + o

        h = ln(x, p["ln2_g"], p["ln2_b"])
        h = jnp.einsum("bpnc,cd->bpnd", h, p["w1"], precision=hp) + p["b1"]
        h = h * jax.nn.sigmoid(h)
        h = jnp.einsum("bpnc,cd->bpnd", h, p["w2"], precision=hp) + p["b2"]
        x = x + h
    return x


if __name__ == "__main__":
    key = jax.random.PRNGKey(0)
    kx, kp = jax.random.split(key)

    # x: (batch, patches, tokens, dim) as implied by rearrange 'b p n (h d) ...'
    b, pch, n, dim = 2, 2, 8, 32
    depth, heads, dim_head, mlp_dim = 2, 2, 16, 64

    model = Transformer(dim, depth, heads, dim_head, mlp_dim, key=kp)
    x = jax.random.normal(kx, (b, pch, n, dim), dtype=jnp.float32)

    y = model(x)
    jax.block_until_ready(y)

    ref = _reference_transformer(x, model)
    assert y.shape == x.shape
    assert jnp.allclose(y, ref, atol=2e-3, rtol=2e-3), float(jnp.max(jnp.abs(y - ref)))

    print("KERNEL_OK")
</pallas_src>

<mosaic_0001>
module attributes {stable_mosaic.version = 11 : i64} {
  func.func @_ln_packed_kernel(%arg0: i32, %arg1: memref<8x128xf32, #tpu.memory_space<vmem>>, %arg2: memref<1x128xf32, #tpu.memory_space<vmem>>, %arg3: memref<1x128xf32, #tpu.memory_space<vmem>>, %arg4: memref<128x128xf32, #tpu.memory_space<vmem>>, %arg5: memref<8x128xf32, #tpu.memory_space<vmem>>) attributes {dimension_semantics = [#tpu.dimension_semantics<parallel>], iteration_bounds = array<i64: 1>, scalar_prefetch = 0 : i64, scratch_operands = 0 : i64, tpu.core_type = #tpu.core_type<tc>, window_params = [{transform_indices = @transform_0, window_bounds = array<i64: 8, 128>}, {pipeline_mode = #tpu.pipeline_mode<synchronous>, transform_indices = @transform_1, window_bounds = array<i64: 1, 128>}, {pipeline_mode = #tpu.pipeline_mode<synchronous>, transform_indices = @transform_2, window_bounds = array<i64: 1, 128>}, {pipeline_mode = #tpu.pipeline_mode<synchronous>, transform_indices = @transform_3, window_bounds = array<i64: 128, 128>}, {transform_indices = @transform_4, window_bounds = array<i64: 8, 128>}]} {
    %c0 = arith.constant 0 : index
    %c0_0 = arith.constant 0 : index
    %0 = vector.load %arg1[%c0, %c0_0] : memref<8x128xf32, #tpu.memory_space<vmem>>, vector<8x128xf32>
    %c0_1 = arith.constant 0 : index
    %c0_2 = arith.constant 0 : index
    %1 = vector.load %arg4[%c0_1, %c0_2] : memref<128x128xf32, #tpu.memory_space<vmem>>, vector<128x128xf32>
    %cst = arith.constant dense<0.000000e+00> : vector<8x128xf32>
    %2 = tpu.matmul %0, %1, %cst {dimension_numbers = #tpu.dot_dimension_numbers<[1], [0], [0], [1], [0, 0, 1, 1], [], []>} : vector<8x128xf32>, vector<128x128xf32>, vector<8x128xf32> -> vector<8x128xf32>
    %3 = arith.mulf %0, %0 : vector<8x128xf32>
    %cst_3 = arith.constant dense<0.000000e+00> : vector<8x128xf32>
    %4 = tpu.matmul %3, %1, %cst_3 {dimension_numbers = #tpu.dot_dimension_numbers<[1], [0], [0], [1], [0, 0, 1, 1], [], []>} : vector<8x128xf32>, vector<128x128xf32>, vector<8x128xf32> -> vector<8x128xf32>
    %cst_4 = arith.constant 3.125000e-02 : f32
    %5 = vector.broadcast %cst_4 : f32 to vector<8x128xf32>
    %6 = arith.mulf %2, %5 : vector<8x128xf32>
    %cst_5 = arith.constant 3.125000e-02 : f32
    %7 = vector.broadcast %cst_5 : f32 to vector<8x128xf32>
    %8 = arith.mulf %4, %7 : vector<8x128xf32>
    %9 = arith.mulf %6, %6 : vector<8x128xf32>
    %10 = arith.subf %8, %9 : vector<8x128xf32>
    %cst_6 = arith.constant 0.000000e+00 : f32
    %11 = vector.broadcast %cst_6 : f32 to vector<8x128xf32>
    %12 = arith.maximumf %10, %11 : vector<8x128xf32>
    %cst_7 = arith.constant 9.99999974E-6 : f32
    %13 = vector.broadcast %cst_7 : f32 to vector<8x128xf32>
    %14 = arith.addf %12, %13 : vector<8x128xf32>
    %15 = math.rsqrt %14 : vector<8x128xf32>
    %c0_8 = arith.constant 0 : index
    %c0_9 = arith.constant 0 : index
    %16 = vector.load %arg2[%c0_8, %c0_9] : memref<1x128xf32, #tpu.memory_space<vmem>>, vector<1x128xf32>
    %17 = vector.broadcast %16 : vector<1x128xf32> to vector<8x128xf32>
    %18 = arith.mulf %15, %17 : vector<8x128xf32>
    %19 = arith.subf %0, %6 : vector<8x128xf32>
    %20 = arith.mulf %19, %18 : vector<8x128xf32>
    %c0_10 = arith.constant 0 : index
    %c0_11 = arith.constant 0 : index
    %21 = vector.load %arg3[%c0_10, %c0_11] : memref<1x128xf32, #tpu.memory_space<vmem>>, vector<1x128xf32>
    %22 = vector.broadcast %21 : vector<1x128xf32> to vector<8x128xf32>
    %23 = arith.addf %20, %22 : vector<8x128xf32>
    %c0_12 = arith.constant 0 : index
    %c0_13 = arith.constant 0 : index
    %24 = vector.load %arg5[%c0_12, %c0_13] : memref<8x128xf32, #tpu.memory_space<vmem>>, vector<8x128xf32>
    tpu.vector_store %arg5[%c0_12, %c0_13], %23 {strides = array<i32>} : memref<8x128xf32, #tpu.memory_space<vmem>>, vector<8x128xf32>,
    return
  }
  func.func @transform_0(%arg0: i32) -> (i32, i32) {
    %c0_i32 = arith.constant 0 : i32
    %c0_i32_0 = arith.constant 0 : i32
    return %arg0, %c0_i32 : i32, i32
  }
  func.func @transform_1(%arg0: i32) -> (i32, i32) {
    %c0_i32 = arith.constant 0 : i32
    %c0_i32_0 = arith.constant 0 : i32
    %c0_i32_1 = arith.constant 0 : i32
    return %c0_i32, %c0_i32_0 : i32, i32
  }
  func.func @transform_2(%arg0: i32) -> (i32, i32) {
    %c0_i32 = arith.constant 0 : i32
    %c0_i32_0 = arith.constant 0 : i32
    %c0_i32_1 = arith.constant 0 : i32
    return %c0_i32, %c0_i32_0 : i32, i32
  }
  func.func @transform_3(%arg0: i32) -> (i32, i32) {
    %c0_i32 = arith.constant 0 : i32
    %c0_i32_0 = arith.constant 0 : i32
    %c0_i32_1 = arith.constant 0 : i32
    return %c0_i32, %c0_i32_0 : i32, i32
  }
  func.func @transform_4(%arg0: i32) -> (i32, i32) {
    %c0_i32 = arith.constant 0 : i32
    %c0_i32_0 = arith.constant 0 : i32
    return %arg0, %c0_i32 : i32, i32
  }
}

</mosaic_0001>

<bundles_post_ra>
// kernel: tpu_custom_call.1
= control target key start
LH: loop header
LB: loop body
LE: loop exit
PB: predicated region body
PF: predicated region fallthrough
CT: control target
= control target key end

     0   :  { %9 = vsyncpa [#allocation3], 0  ;;  %s562_s0 = inlined_call_operand.hbm [shape: f32[8,128], index: 0, kind: input, shape index: {}]   ;;  %s563_s1 = inlined_call_operand.vmem [shape: f32[1,128], index: 1, kind: input, shape index: {}]   ;;  %s564_s2 = inlined_call_operand.vmem [shape: f32[1,128], index: 2, kind: input, shape index: {}]   ;;  %s565_s3 = inlined_call_operand.hbm [shape: f32[128,128], index: 3, kind: input, shape index: {}]   ;;  %s566_s4 = inlined_call_operand.hbm [shape: f32[8,128], index: 4, kind: output, shape index: {}]  }
   0x1   :  { %10 = vsyncpa [#allocation6], 0 }
   0x2   :  { %11 = vsyncpa [#allocation4], 0  ;;  %s480_s15 = smov [#allocation2]   ;;  %s481_s17 = smov [#allocation5]  }
   0x3   :  { %s18_s16 = sshll.u32 %s480_s15, 4  ;;  %s31_s18 = sshll.u32 %s481_s17, 4  ;;  %s19_s16 = int_to_ptr.vmem [resolvable:$true] %s18_s16  ;;  %s513_s18 = int_to_ptr.vmem [resolvable:$true] %s31_s18 }
   0x4   :  { %s408_s21 = scalar_lea.hbm %s562_s0, 128 }
   0x5   :  { %p409_p0 = scmp.ne.s32.totalorder %s562_s0, %s408_s21  ;;  %p412_p1 = scmp.lt.u32.totalorder %s408_s21, %s562_s0 }
   0x7   :  { %p414_p2 = pnand %p412_p1, %p409_p0 }
   0x9   :  { %417 = shalt.err (!%p414_p2)
}
   0xa   :  { %s418_s26 = scalar_lea.vmem %s19_s16, 128  ;;  %p423_p4 = scmp.lt.s32.totalorder %s19_s16, %s19_s16 }
   0xb   :  { %p419_p3 = scmp.ne.s32.totalorder %s19_s16, %s418_s26  ;;  %p424_p5 = scmp.lt.s32.totalorder %s418_s26, %s418_s26 }
   0xd   :  { %p425_p6 = por %p424_p5, %p423_p4 }
   0xf   :  { %p426_p7 = pnand %p425_p6, %p419_p3 }
  0x11   :  { %429 = shalt.err (!%p426_p7)
}
  0x12   :  { %21 = dma.hbm_to_vmem [thread:$0]  %s562_s0, 128, %s19_s16, [#allocation3]  }
  0x13   :  { %s430_s5 = scalar_lea.hbm %s565_s3, 2048 }
  0x14   :  { %p431_p8 = scmp.ne.s32.totalorder %s565_s3, %s430_s5  ;;  %p434_p9 = scmp.lt.u32.totalorder %s430_s5, %s565_s3 }
  0x16   :  { %p436_p10 = pnand %p434_p9, %p431_p8 }
  0x18   :  { %439 = shalt.err (!%p436_p10)
}
  0x19   :  { %s440_s10 = scalar_lea.vmem %s513_s18, 2048  ;;  %p445_p12 = scmp.lt.s32.totalorder %s513_s18, %s513_s18 }
  0x1a   :  { %p441_p11 = scmp.ne.s32.totalorder %s513_s18, %s440_s10  ;;  %p446_p13 = scmp.lt.s32.totalorder %s440_s10, %s440_s10 }
  0x1c   :  { %p447_p0 = por %p446_p13, %p445_p12 }
  0x1e   :  { %p448_p1 = pnand %p447_p0, %p441_p11 }
  0x20   :  { %451 = shalt.err (!%p448_p1)
}
  0x21   :  { %s482_s0 = smov 128   ;;  %s483_s11 = smov 8  }
  0x22   :  { %37 = dma.hbm_to_vmem [thread:$0]  %s565_s3, 2048, %s513_s18, [#allocation6], %s482_s0, %s482_s0, %s483_s11  }
  0x23   :  { %474 = dma.done.wait [#allocation3], 128  }
  0x24   :  { %475 = vsyncadd [#allocation3], 4294967168 }
  0x25   :  { %476 = dma.done.wait [#allocation6], 2048  }
  0x26   :  { %477 = vsyncadd [#allocation6], 4294965248  ;;  %v484_v0 = vmov 0.0|0.0   ;;  %vm485_vm0 = vmmov 0   ;;  %v486_v1 = vmov 0.0   ;;  %v45_v2 = vld [vmem:[#allocation5] sm:$0xff] }
  0x27   :  { %350 = vmatprep.subr.bf16.mxu0 %v484_v0  ;;  %374 = vmatprep.subr.bf16.mxu1 %v484_v0  ;;  %v46_v3 = vld [vmem:[#allocation5 + $0x8] sm:$0xff]  ;;  %v47_v4 = vld [vmem:[#allocation5 + $0x10] sm:$0xff]  ;;  %v48_v6 = vld [vmem:[#allocation5 + $0x18] sm:$0xff]  ;;  %s487_s17 = smov [#allocation7]  }
  0x28   :  { %312 = vmatprep.mubr.msk.f32.mxu0 %vm485_vm0, %v486_v1  ;;  %347 = vmatprep.mubr.msk.f32.mxu1 %vm485_vm0, %v486_v1  ;;  %v351_v5 = vpack.c.bf16 %v46_v3, %v45_v2  ;;  %v354_v7 = vpack.c.bf16 %v48_v6, %v47_v4  ;;  %v49_v8 = vld [vmem:[#allocation5 + $0x20] sm:$0xff]  ;;  %v50_v9 = vld [vmem:[#allocation5 + $0x28] sm:$0xff]  ;;  %v51_v11 = vld [vmem:[#allocation5 + $0x30] sm:$0xff]  ;;  %s234_s18 = sshll.u32 %s487_s17, 4  ;;  %s235_s18 = int_to_ptr.vmem [resolvable:$true] %s234_s18 }
  0x29   :  { %v357_v10 = vpack.c.bf16 %v50_v9, %v49_v8  ;;  %v52_v12 = vld [vmem:[#allocation5 + $0x38] sm:$0xff]  ;;  %v53_v14 = vld [vmem:[#allocation5 + $0x40] sm:$0xff]  ;;  %v54_v15 = vld [vmem:[#allocation5 + $0x48] sm:$0xff]  ;;  %s452_s19 = scalar_lea.vmem %s235_s18, 128  ;;  %p457_p3 = scmp.lt.s32.totalorder %s235_s18, %s235_s18 }
  0x2a   :  { %352 = vmatpush3.bf16.msra.mxu0 %v351_v5  ;;  %376 = vmatpush3.bf16.msra.mxu1 %v351_v5  ;;  %v360_v13 = vpack.c.bf16 %v52_v12, %v51_v11  ;;  %v363_v16 = vpack.c.bf16 %v54_v15, %v53_v14  ;;  %v55_v17 = vld [vmem:[#allocation5 + $0x50] sm:$0xff]  ;;  %v56_v18 = vld [vmem:[#allocation5 + $0x58] sm:$0xff]  ;;  %v57_v20 = vld [vmem:[#allocation5 + $0x60] sm:$0xff]  ;;  %p453_p2 = scmp.ne.s32.totalorder %s235_s18, %s452_s19  ;;  %p458_p4 = scmp.lt.s32.totalorder %s452_s19, %s452_s19 }
  0x2b   :  { %353 = vmatprep.subr.bf16.mxu0 %v484_v0  ;;  %377 = vmatprep.subr.bf16.mxu1 %v484_v0  ;;  %v366_v19 = vpack.c.bf16 %v56_v18, %v55_v17  ;;  %v58_v21 = vld [vmem:[#allocation5 + $0x68] sm:$0xff]  ;;  %v59_v23 = vld [vmem:[#allocation5 + $0x70] sm:$0xff]  ;;  %v60_v24 = vld [vmem:[#allocation5 + $0x78] sm:$0xff] }
  0x2c   :  { %v369_v22 = vpack.c.bf16 %v58_v21, %v57_v20  ;;  %v372_v25 = vpack.c.bf16 %v60_v24, %v59_v23  ;;  %v44_v26 = vld [vmem:[#allocation2] sm:$0xff]  ;;  %p459_p5 = por %p458_p4, %p457_p3 }
  0x2d   :  { %v131_v27 = vmul.f32 %v44_v26, %v44_v26  ;;  %v244_v38 = vld [vmem:[%s563_s1] ss:$0 sm:$0xff] }
  0x2e   :  { %355 = vmatpush3.bf16.msra.mxu0 %v354_v7  ;;  %379 = vmatpush3.bf16.msra.mxu1 %v354_v7  ;;  %v245_v42 = vld [vmem:[%s564_s2] ss:$0 sm:$0xff]  ;;  %p460_p6 = pnand %p459_p5, %p453_p2 }
  0x2f   :  { %356 = vmatprep.subr.bf16.mxu0 %v484_v0  ;;  %380 = vmatprep.subr.bf16.mxu1 %v484_v0 }
  0x32   :  { %358 = vmatpush3.bf16.msra.mxu0 %v357_v10  ;;  %382 = vmatpush3.bf16.msra.mxu1 %v357_v10 }
  0x33   :  { %359 = vmatprep.subr.bf16.mxu0 %v484_v0  ;;  %383 = vmatprep.subr.bf16.mxu1 %v484_v0 }
  0x36   :  { %361 = vmatpush3.bf16.msra.mxu0 %v360_v13  ;;  %385 = vmatpush3.bf16.msra.mxu1 %v360_v13 }
  0x37   :  { %362 = vmatprep.subr.bf16.mxu0 %v484_v0  ;;  %386 = vmatprep.subr.bf16.mxu1 %v484_v0 }
  0x3a   :  { %364 = vmatpush3.bf16.msra.mxu0 %v363_v16  ;;  %388 = vmatpush3.bf16.msra.mxu1 %v363_v16 }
  0x3b   :  { %365 = vmatprep.subr.bf16.mxu0 %v484_v0  ;;  %389 = vmatprep.subr.bf16.mxu1 %v484_v0 }
  0x3e   :  { %367 = vmatpush3.bf16.msra.mxu0 %v366_v19  ;;  %391 = vmatpush3.bf16.msra.mxu1 %v366_v19 }
  0x3f   :  { %368 = vmatprep.subr.bf16.mxu0 %v484_v0  ;;  %392 = vmatprep.subr.bf16.mxu1 %v484_v0 }
  0x42   :  { %370 = vmatpush3.bf16.msra.mxu0 %v369_v22  ;;  %394 = vmatpush3.bf16.msra.mxu1 %v369_v22 }
  0x43   :  { %371 = vmatprep.subr.bf16.mxu0 %v484_v0  ;;  %395 = vmatprep.subr.bf16.mxu1 %v484_v0 }
  0x46   :  { %373 = vmatpush3.bf16.msra.mxu0 %v372_v25  ;;  %397 = vmatpush3.bf16.msra.mxu1 %v372_v25 }
  0x49   :  { %313 = vmatmul.mubr.f32.vlgmr.msra.gmra.mrb[0].mxu0 %v44_v26  ;;  %348 = vmatmul.mubr.f32.vlgmr.msra.gmra.mrb[0].mxu1 %v131_v27 }
 0x11c   :  { %v127_v28 = vpop.f32.mrb[0].mxu0  ;;  %v198_v29 = vpop.f32.mrb[0].mxu1 }
 0x11d   :  { %v202_v30 = vmul.f32 0.03125, %v127_v28  ;;  %v314_v31 = vpop.f32.mrb[1].mxu0  ;;  %v203_v32 = vmul.f32 0.03125, %v198_v29  ;;  %v349_v33 = vpop.f32.mrb[1].mxu1 }
 0x11f   :  { %v204_v34 = vmul.f32 %v202_v30, %v202_v30  ;;  %v217_v40 = vsub.f32 %v44_v26, %v202_v30 }
 0x121   :  { %v205_v35 = vsub.f32 %v203_v32, %v204_v34 }
 0x123   :  { %v206_v36 = vmax.f32 %v205_v35, 0.0 }
 0x125   :  { %v207_v37 = vadd.f32 1e-05, %v206_v36 }
 0x127   :  { %406 = vrsqrt.f32 %v207_v37 }
 0x131   :  { %v407_v39 = vpop.eup %406 }
 0x132   :  { %v216_v41 = vmul.f32 %v407_v39, %v244_v38 }
 0x134   :  { %v218_v43 = vmul.f32 %v217_v40, %v216_v41 }
 0x136   :  { %v226_v44 = vadd.f32 %v245_v42, %v218_v43 }
 0x138   :  { %227 = vst [vmem:[#allocation7] sm:$0xff] %v226_v44 }
 0x139   :  { %463 = shalt.err (!%p460_p6)
}
 0x13a   :  { %s464_s21 = scalar_lea.hbm %s566_s4, 128 }
 0x13b   :  { %p465_p7 = scmp.ne.s32.totalorder %s566_s4, %s464_s21  ;;  %p468_p8 = scmp.lt.u32.totalorder %s464_s21, %s566_s4 }
 0x13d   :  { %p470_p9 = pnand %p468_p8, %p465_p7 }
 0x13f   :  { %473 = shalt.err (!%p470_p9)
}
 0x140   :  { %237 = dma.vmem_to_hbm [thread:$0]  %s235_s18, 128, %s566_s4, [#allocation4]  }
 0x141   :  { %478 = dma.done.wait [#allocation4], 128  }
 0x142   :  { %479 = vsyncadd [#allocation4], 4294967168 }
 0x143   :  { %241 = vsyncpa [#allocation3], 1 }
 0x144   :  { %242 = vsyncpa [#allocation6], 1 }
 0x145   :  { %243 = vsyncpa [#allocation4], 1 }

</bundles_post_ra>
